<compile_context>
chip_gen: v7x
topology: tpu7x:2x2x1
jax: 0.10.0
libtpu: 0.0.40
codegen_flags: <defaults>
</compile_context>

<pallas_src>
import functools

import jax
import jax.numpy as jnp
from jax.experimental import pallas as pl
from jax.experimental.pallas import tpu as pltpu

# nn.LayerNorm default eps (the spec module builds nn.LayerNorm with defaults).
# Real HF ALBERT checkpoints use config.layer_norm_eps = 1e-12; pass
# ln_eps=1e-12 to albert_mlm_head when matching a real checkpoint.
LN_EPS = 1e-5


def _gelu_new(x):
    # ALBERT default hidden_act = "gelu_new" (tanh approximation)
    return 0.5 * x * (1.0 + jnp.tanh(0.7978845608028654 * (x + 0.044715 * x * x * x)))


def _round_up(x, m):
    return ((x + m - 1) // m) * m


@functools.lru_cache(maxsize=1)
def _vmem_capacity_bytes():
    try:
        cap = getattr(pltpu.get_tpu_info(), "vmem_capacity_bytes", None)
        if cap:
            return int(cap)
    except Exception:
        pass
    return 64 << 20  # conservative fallback: assume v7x-class per-core VMEM


def _vmem_limit_bytes(tm, tn, H, E, V_pad, x_bytes, out_bytes, wdec_full):
    bf16, f32 = 2, 4
    wdec_cols = V_pad if wdec_full else tn
    est = (2 * tm * H * x_bytes          # x tiles (double-buffered)
           + 2 * H * E * bf16            # dense weight (grid-invariant, 2 bufs)
           + 2 * E * wdec_cols * bf16    # decoder weight (resident or tiles)
           + 2 * wdec_cols * f32         # decoder bias
           + 2 * tm * tn * out_bytes     # output tiles
           + tm * E * bf16               # cached LN output scratch (bf16)
           + (1 << 20))                  # small (1, E) params + slack
    cap = _vmem_capacity_bytes()
    if cap <= (64 << 20):                # v7x-class: leave Mosaic-scratch headroom
        cap = cap - (8 << 20)
    else:                                # v5e / v6e (128 MiB physical): use most of it
        cap = min(cap - (16 << 20), 112 << 20)
    return min(max(int(1.15 * est), 16 << 20), cap)


def mlm_head_kernel(x_ref, wd_ref, bd_ref, gamma_ref, beta_ref, wdec_ref, bdec_ref,
                    out_ref, h_ref, *, ln_eps, tn, wdec_full):
    # x_ref:   (tm, H)  bf16        wd_ref:   (H, E) bf16
    # bd/gamma/beta: (1, E) f32     wdec_ref: (E, tn) or (E, V_pad) bf16
    # bdec_ref: (1, tn) or (1, V_pad) f32
    # out_ref: (tm, tn)             h_ref: (tm, E) bf16 scratch (persists over j)
    @pl.when(pl.program_id(1) == 0)
    def _compute_hidden():
        # dense: hidden -> embedding (bf16 MXU matmul, f32 accumulation)
        h = jnp.dot(x_ref[...], wd_ref[...], preferred_element_type=jnp.float32)
        h = h + bd_ref[...]
        # activation
        h = _gelu_new(h)
        # LayerNorm over embedding dim (f32)
        mean = jnp.mean(h, axis=-1, keepdims=True)
        var = jnp.mean((h - mean) * (h - mean), axis=-1, keepdims=True)
        h = (h - mean) * jax.lax.rsqrt(var + ln_eps)
        h = h * gamma_ref[...] + beta_ref[...]
        h_ref[...] = h.astype(h_ref.dtype)   # cast to bf16 ONCE per token tile

    if wdec_full:
        # decoder weight fully resident in VMEM; take the 128-aligned vocab slab
        j0 = pl.multiple_of(pl.program_id(1) * tn, 128)
        w = wdec_ref[:, pl.ds(j0, tn)]
        b = bdec_ref[:, pl.ds(j0, tn)]
    else:
        w = wdec_ref[...]
        b = bdec_ref[...]

    scores = jnp.dot(h_ref[...], w, preferred_element_type=jnp.float32)
    out_ref[...] = (scores + b).astype(out_ref.dtype)


@functools.partial(
    jax.jit,
    static_argnames=("tm", "tn", "ln_eps", "vocab_size", "out_dtype", "return_padded"))
def albert_mlm_head(hidden_states, wd, bd, gamma, beta, wdec, bdec, *,
                    tm=1024, tn=2048, ln_eps=LN_EPS, vocab_size=None,
                    out_dtype=None, return_padded=False):
    """hidden_states: [B, S, H] -> prediction_scores: [B, S, V].

    wd: [H, E] bf16, wdec: [E, V_pad] bf16 (pre-transposed / pre-padded, see
    prepare_params).  bd/gamma/beta: [1, E] f32, bdec: [1, V_pad] f32.
    Pass bf16 hidden_states to skip the in-jit cast copy.  vocab_size selects
    how many logit columns are real.  return_padded=True skips the post-kernel
    slice copy (caller must mask padded rows/cols); out_dtype=jnp.bfloat16
    halves kernel HBM writes if the downstream loss accepts bf16 logits.
    """
    B, S, H = hidden_states.shape
    E = wd.shape[1]
    V_in = wdec.shape[1]
    V = V_in if vocab_size is None else vocab_size
    M = B * S
    out_dtype = hidden_states.dtype if out_dtype is None else jnp.dtype(out_dtype)

    # --- tile plan -----------------------------------------------------------
    tm = max(16, min(tm, _round_up(M, 16)))
    # keep >= 2 token tiles when possible so v7x's two TensorCores both work
    if M >= 32 and _round_up(M, tm) // tm < 2:
        tm = max(16, _round_up((M + 1) // 2, 16))
    M_pad = _round_up(M, tm)

    tn = _round_up(min(tn, _round_up(V_in, 128)), 128)
    V_pad = _round_up(V_in, tn)

    # --- operand prep (heavy prep lives in prepare_params, outside jit) ------
    x = hidden_states.reshape(M, H)
    if x.dtype != jnp.bfloat16:
        x = x.astype(jnp.bfloat16)           # no-op if caller already passes bf16
    if M_pad != M:
        x = jnp.pad(x, ((0, M_pad - M), (0, 0)))
    if V_pad != V_in:                        # normally a no-op (prepare_params pads)
        wdec = jnp.pad(wdec, ((0, 0), (0, V_pad - V_in)))
        bdec = jnp.pad(bdec, ((0, 0), (0, V_pad - V_in)))

    # Keep the full decoder weight VMEM-resident when small (ALBERT: E=128 ->
    # ~8 MiB); otherwise stream (E, tn) tiles per vocab step.
    wdec_full = (2 * E * V_pad * 2) <= (24 << 20)

    if wdec_full:
        wdec_spec = pl.BlockSpec((E, V_pad), lambda i, j: (0, 0))
        bdec_spec = pl.BlockSpec((1, V_pad), lambda i, j: (0, 0))
    else:
        wdec_spec = pl.BlockSpec((E, tn), lambda i, j: (0, j))
        bdec_spec = pl.BlockSpec((1, tn), lambda i, j: (0, j))

    grid = (M_pad // tm, V_pad // tn)        # vocab innermost -> h scratch reuse
    kernel = functools.partial(mlm_head_kernel, ln_eps=ln_eps, tn=tn,
                               wdec_full=wdec_full)

    out = pl.pallas_call(
        kernel,
        out_shape=jax.ShapeDtypeStruct((M_pad, V_pad), out_dtype),
        grid_spec=pltpu.PrefetchScalarGridSpec(
            num_scalar_prefetch=0,
            grid=grid,
            in_specs=[
                pl.BlockSpec((tm, H), lambda i, j: (i, 0)),   # x tile (bf16)
                pl.BlockSpec((H, E), lambda i, j: (0, 0)),    # dense weight (bf16)
                pl.BlockSpec((1, E), lambda i, j: (0, 0)),    # dense bias
                pl.BlockSpec((1, E), lambda i, j: (0, 0)),    # LN gamma
                pl.BlockSpec((1, E), lambda i, j: (0, 0)),    # LN beta
                wdec_spec,                                    # decoder weight
                bdec_spec,                                    # decoder bias
            ],
            out_specs=pl.BlockSpec((tm, tn), lambda i, j: (i, j)),
            scratch_shapes=[pltpu.VMEM((tm, E), jnp.bfloat16)],  # cached LN output
        ),
        compiler_params=pltpu.CompilerParams(
            dimension_semantics=("parallel", "arbitrary"),
            vmem_limit_bytes=_vmem_limit_bytes(
                tm, tn, H, E, V_pad, x.dtype.itemsize, out_dtype.itemsize,
                wdec_full)),
    )(x, wd, bd, gamma, beta, wdec, bdec)

    if return_padded:
        # (M_pad, V_pad): padded token rows contain LayerNorm-of-zeros garbage
        # and padded vocab columns are zero logits -> consumer must mask.
        return out
    if M_pad != M or V_pad != V:
        out = out[:M, :V]
    return out.reshape(B, S, V)


def prepare_params(params, vocab_tile=2048):
    """One-time (OUTSIDE jit) transpose + cast + vocab-pad of PyTorch-layout params.

    vocab_tile should match the `tn` you call albert_mlm_head with so no
    per-call padding copy is needed.
    """
    E = params["dense_w"].shape[0]
    V = params["decoder_w"].shape[0]
    pad_to = min(vocab_tile, _round_up(V, 128))
    V_pad = _round_up(V, pad_to)

    wdec = jnp.asarray(params["decoder_w"]).T.astype(jnp.bfloat16)   # [E, V]
    bdec = jnp.asarray(params["bias"], jnp.float32).reshape(1, V)
    if V_pad != V:
        wdec = jnp.pad(wdec, ((0, 0), (0, V_pad - V)))
        bdec = jnp.pad(bdec, ((0, 0), (0, V_pad - V)))

    return (
        jnp.asarray(params["dense_w"]).T.astype(jnp.bfloat16),       # [H, E]
        jnp.asarray(params["dense_b"], jnp.float32).reshape(1, E),
        jnp.asarray(params["ln_gamma"], jnp.float32).reshape(1, E),
        jnp.asarray(params["ln_beta"], jnp.float32).reshape(1, E),
        wdec,                                                        # [E, V_pad]
        bdec,                                                        # [1, V_pad]
    )


def reference_forward(hidden_states, params, ln_eps=LN_EPS):
    h = hidden_states @ params["dense_w"].T + params["dense_b"]
    h = _gelu_new(h)
    mean = jnp.mean(h, axis=-1, keepdims=True)
    var = jnp.mean((h - mean) ** 2, axis=-1, keepdims=True)
    h = (h - mean) / jnp.sqrt(var + ln_eps)
    h = h * params["ln_gamma"] + params["ln_beta"]
    return h @ params["decoder_w"].T + params["bias"]


def init_params(key, hidden_size, embedding_size, vocab_size):
    k1, k2, k3 = jax.random.split(key, 3)
    scale_d = 1.0 / jnp.sqrt(hidden_size)
    scale_dec = 1.0 / jnp.sqrt(embedding_size)
    return {
        "dense_w": jax.random.uniform(k1, (embedding_size, hidden_size),
                                      jnp.float32, -scale_d, scale_d),
        "dense_b": jax.random.uniform(k2, (embedding_size,),
                                      jnp.float32, -scale_d, scale_d),
        "ln_gamma": jnp.ones((embedding_size,), jnp.float32),
        "ln_beta": jnp.zeros((embedding_size,), jnp.float32),
        "decoder_w": jax.random.uniform(k3, (vocab_size, embedding_size),
                                        jnp.float32, -scale_dec, scale_dec),
        "bias": jnp.zeros((vocab_size,), jnp.float32),  # tied decoder bias
    }


if __name__ == "__main__":
    # Small ALBERT-ish config: hidden=32, embedding=32, vocab=128
    B, S, H, E, V = 2, 8, 32, 32, 128
    key = jax.random.PRNGKey(0)
    kx, kp = jax.random.split(key)
    hidden_states = jax.random.normal(kx, (B, S, H), jnp.float32)
    params = init_params(kp, H, E, V)

    prepped = prepare_params(params)            # transpose + bf16 cast + pad, once
    out = albert_mlm_head(hidden_states, *prepped, vocab_size=V)
    out = jax.block_until_ready(out)

    ref = reference_forward(hidden_states, params)
    assert out.shape == (B, S, V)
    max_err = float(jnp.max(jnp.abs(out - ref)))
    # bf16 MXU matmuls with f32 accumulation vs a pure-f32 reference.
    assert jnp.allclose(out, ref, atol=5e-2, rtol=5e-2), max_err
    print("KERNEL_OK")
</pallas_src>

<mosaic_0001>
module attributes {stable_mosaic.version = 11 : i64} {
  func.func @mlm_head_kernel(%arg0: i32, %arg1: i32, %arg2: memref<16x32xbf16, #tpu.memory_space<vmem>>, %arg3: memref<32x32xbf16, #tpu.memory_space<vmem>>, %arg4: memref<1x32xf32, #tpu.memory_space<vmem>>, %arg5: memref<1x32xf32, #tpu.memory_space<vmem>>, %arg6: memref<1x32xf32, #tpu.memory_space<vmem>>, %arg7: memref<32x128xbf16, #tpu.memory_space<vmem>>, %arg8: memref<1x128xf32, #tpu.memory_space<vmem>>, %arg9: memref<16x128xf32, #tpu.memory_space<vmem>>, %arg10: memref<16x32xbf16, #tpu.memory_space<vmem>>) attributes {dimension_semantics = [#tpu.dimension_semantics<parallel>, #tpu.dimension_semantics<arbitrary>], iteration_bounds = array<i64: 1, 1>, scalar_prefetch = 0 : i64, scratch_operands = 1 : i64, tpu.core_type = #tpu.core_type<tc>, window_params = [{transform_indices = @transform_0, window_bounds = array<i64: 16, 32>}, {pipeline_mode = #tpu.pipeline_mode<synchronous>, transform_indices = @transform_1, window_bounds = array<i64: 32, 32>}, {pipeline_mode = #tpu.pipeline_mode<synchronous>, transform_indices = @transform_2, window_bounds = array<i64: 1, 32>}, {pipeline_mode = #tpu.pipeline_mode<synchronous>, transform_indices = @transform_3, window_bounds = array<i64: 1, 32>}, {pipeline_mode = #tpu.pipeline_mode<synchronous>, transform_indices = @transform_4, window_bounds = array<i64: 1, 32>}, {pipeline_mode = #tpu.pipeline_mode<synchronous>, transform_indices = @transform_5, window_bounds = array<i64: 32, 128>}, {pipeline_mode = #tpu.pipeline_mode<synchronous>, transform_indices = @transform_6, window_bounds = array<i64: 1, 128>}, {transform_indices = @transform_7, window_bounds = array<i64: 16, 128>}]} {
    %c0_i32 = arith.constant 0 : i32
    %0 = arith.cmpi eq, %arg1, %c0_i32 : i32
    %1 = arith.extui %0 : i1 to i32
    %c0_i32_0 = arith.constant 0 : i32
    %2 = arith.cmpi ne, %1, %c0_i32_0 : i32
    scf.if %2 {
      %c0_6 = arith.constant 0 : index
      %c0_7 = arith.constant 0 : index
      %14 = vector.load %arg2[%c0_6, %c0_7] : memref<16x32xbf16, #tpu.memory_space<vmem>>, vector<16x32xbf16>
      %c0_8 = arith.constant 0 : index
      %c0_9 = arith.constant 0 : index
      %15 = vector.load %arg3[%c0_8, %c0_9] : memref<32x32xbf16, #tpu.memory_space<vmem>>, vector<32x32xbf16>
      %cst_10 = arith.constant dense<0.000000e+00> : vector<16x32xf32>
      %16 = tpu.matmul %14, %15, %cst_10 {dimension_numbers = #tpu.dot_dimension_numbers<[1], [0], [0], [1], [0, 0, 1, 1], [], []>} : vector<16x32xbf16>, vector<32x32xbf16>, vector<16x32xf32> -> vector<16x32xf32>
      %c0_11 = arith.constant 0 : index
      %c0_12 = arith.constant 0 : index
      %17 = vector.load %arg4[%c0_11, %c0_12] : memref<1x32xf32, #tpu.memory_space<vmem>>, vector<1x32xf32>
      %18 = vector.broadcast %17 : vector<1x32xf32> to vector<16x32xf32>
      %19 = arith.addf %16, %18 : vector<16x32xf32>
      %cst_13 = arith.constant 5.000000e-01 : f32
      %20 = vector.broadcast %cst_13 : f32 to vector<16x32xf32>
      %21 = arith.mulf %20, %19 : vector<16x32xf32>
      %cst_14 = arith.constant 4.471500e-02 : f32
      %22 = vector.broadcast %cst_14 : f32 to vector<16x32xf32>
      %23 = arith.mulf %22, %19 : vector<16x32xf32>
      %24 = arith.mulf %23, %19 : vector<16x32xf32>
      %25 = arith.mulf %24, %19 : vector<16x32xf32>
      %26 = arith.addf %19, %25 : vector<16x32xf32>
      %cst_15 = arith.constant 0.797884583 : f32
      %27 = vector.broadcast %cst_15 : f32 to vector<16x32xf32>
      %28 = arith.mulf %27, %26 : vector<16x32xf32>
      %29 = math.tanh %28 : vector<16x32xf32>
      %cst_16 = arith.constant 1.000000e+00 : f32
      %30 = vector.broadcast %cst_16 : f32 to vector<16x32xf32>
      %31 = arith.addf %30, %29 : vector<16x32xf32>
      %32 = arith.mulf %21, %31 : vector<16x32xf32>
      %cst_17 = arith.constant dense<0.000000e+00> : vector<16xf32>
      %33 = vector.multi_reduction <add>, %32, %cst_17 [1] : vector<16x32xf32> to vector<16xf32>
      %34 = vector.shape_cast %33 : vector<16xf32> to vector<16x1xf32>
      %cst_18 = arith.constant 3.200000e+01 : f32
      %35 = vector.broadcast %cst_18 : f32 to vector<16x1xf32>
      %36 = arith.divf %34, %35 : vector<16x1xf32>
      %37 = vector.broadcast %36 : vector<16x1xf32> to vector<16x32xf32>
      %38 = arith.subf %32, %37 : vector<16x32xf32>
      %39 = vector.broadcast %36 : vector<16x1xf32> to vector<16x32xf32>
      %40 = arith.subf %32, %39 : vector<16x32xf32>
      %41 = arith.mulf %38, %40 : vector<16x32xf32>
      %cst_19 = arith.constant dense<0.000000e+00> : vector<16xf32>
      %42 = vector.multi_reduction <add>, %41, %cst_19 [1] : vector<16x32xf32> to vector<16xf32>
      %43 = vector.shape_cast %42 : vector<16xf32> to vector<16x1xf32>
      %cst_20 = arith.constant 3.200000e+01 : f32
      %44 = vector.broadcast %cst_20 : f32 to vector<16x1xf32>
      %45 = arith.divf %43, %44 : vector<16x1xf32>
      %46 = vector.broadcast %36 : vector<16x1xf32> to vector<16x32xf32>
      %47 = arith.subf %32, %46 : vector<16x32xf32>
      %cst_21 = arith.constant 9.99999974E-6 : f32
      %48 = vector.broadcast %cst_21 : f32 to vector<16x1xf32>
      %49 = arith.addf %45, %48 : vector<16x1xf32>
      %50 = math.rsqrt %49 : vector<16x1xf32>
      %51 = vector.broadcast %50 : vector<16x1xf32> to vector<16x32xf32>
      %52 = arith.mulf %47, %51 : vector<16x32xf32>
      %c0_22 = arith.constant 0 : index
      %c0_23 = arith.constant 0 : index
      %53 = vector.load %arg5[%c0_22, %c0_23] : memref<1x32xf32, #tpu.memory_space<vmem>>, vector<1x32xf32>
      %54 = vector.broadcast %53 : vector<1x32xf32> to vector<16x32xf32>
      %55 = arith.mulf %52, %54 : vector<16x32xf32>
      %c0_24 = arith.constant 0 : index
      %c0_25 = arith.constant 0 : index
      %56 = vector.load %arg6[%c0_24, %c0_25] : memref<1x32xf32, #tpu.memory_space<vmem>>, vector<1x32xf32>
      %57 = vector.broadcast %56 : vector<1x32xf32> to vector<16x32xf32>
      %58 = arith.addf %55, %57 : vector<16x32xf32>
      %59 = arith.truncf %58 : vector<16x32xf32> to vector<16x32xbf16>
      %c0_26 = arith.constant 0 : index
      %c0_27 = arith.constant 0 : index
      %60 = vector.load %arg10[%c0_26, %c0_27] : memref<16x32xbf16, #tpu.memory_space<vmem>>, vector<16x32xbf16>
      tpu.vector_store %arg10[%c0_26, %c0_27], %59 {strides = array<i32>} : memref<16x32xbf16, #tpu.memory_space<vmem>>, vector<16x32xbf16>,
    } else {
    }
    %c128_i32 = arith.constant 128 : i32
    %3 = arith.muli %arg1, %c128_i32 : i32
    %4 = tpu.assume_multiple %3, 128 : i32
    %c0 = arith.constant 0 : index
    %5 = arith.index_cast %4 : i32 to index
    %6 = vector.load %arg7[%c0, %5] : memref<32x128xbf16, #tpu.memory_space<vmem>>, vector<32x128xbf16>
    %c0_1 = arith.constant 0 : index
    %7 = arith.index_cast %4 : i32 to index
    %8 = vector.load %arg8[%c0_1, %7] : memref<1x128xf32, #tpu.memory_space<vmem>>, vector<1x128xf32>
    %c0_2 = arith.constant 0 : index
    %c0_3 = arith.constant 0 : index
    %9 = vector.load %arg10[%c0_2, %c0_3] : memref<16x32xbf16, #tpu.memory_space<vmem>>, vector<16x32xbf16>
    %cst = arith.constant dense<0.000000e+00> : vector<16x128xf32>
    %10 = tpu.matmul %9, %6, %cst {dimension_numbers = #tpu.dot_dimension_numbers<[1], [0], [0], [1], [0, 0, 1, 1], [], []>} : vector<16x32xbf16>, vector<32x128xbf16>, vector<16x128xf32> -> vector<16x128xf32>
    %11 = vector.broadcast %8 : vector<1x128xf32> to vector<16x128xf32>
    %12 = arith.addf %10, %11 : vector<16x128xf32>
    %c0_4 = arith.constant 0 : index
    %c0_5 = arith.constant 0 : index
    %13 = vector.load %arg9[%c0_4, %c0_5] : memref<16x128xf32, #tpu.memory_space<vmem>>, vector<16x128xf32>
    tpu.vector_store %arg9[%c0_4, %c0_5], %12 {strides = array<i32>} : memref<16x128xf32, #tpu.memory_space<vmem>>, vector<16x128xf32>,
    return
  }
  func.func @transform_0(%arg0: i32, %arg1: i32) -> (i32, i32) {
    %c0_i32 = arith.constant 0 : i32
    %c0_i32_0 = arith.constant 0 : i32
    return %arg0, %c0_i32 : i32, i32
  }
  func.func @transform_1(%arg0: i32, %arg1: i32) -> (i32, i32) {
    %c0_i32 = arith.constant 0 : i32
    %c0_i32_0 = arith.constant 0 : i32
    %c0_i32_1 = arith.constant 0 : i32
    return %c0_i32, %c0_i32_0 : i32, i32
  }
  func.func @transform_2(%arg0: i32, %arg1: i32) -> (i32, i32) {
    %c0_i32 = arith.constant 0 : i32
    %c0_i32_0 = arith.constant 0 : i32
    %c0_i32_1 = arith.constant 0 : i32
    return %c0_i32, %c0_i32_0 : i32, i32
  }
  func.func @transform_3(%arg0: i32, %arg1: i32) -> (i32, i32) {
    %c0_i32 = arith.constant 0 : i32
    %c0_i32_0 = arith.constant 0 : i32
    %c0_i32_1 = arith.constant 0 : i32
    return %c0_i32, %c0_i32_0 : i32, i32
  }
  func.func @transform_4(%arg0: i32, %arg1: i32) -> (i32, i32) {
    %c0_i32 = arith.constant 0 : i32
    %c0_i32_0 = arith.constant 0 : i32
    %c0_i32_1 = arith.constant 0 : i32
    return %c0_i32, %c0_i32_0 : i32, i32
  }
  func.func @transform_5(%arg0: i32, %arg1: i32) -> (i32, i32) {
    %c0_i32 = arith.constant 0 : i32
    %c0_i32_0 = arith.constant 0 : i32
    %c0_i32_1 = arith.constant 0 : i32
    return %c0_i32, %c0_i32_0 : i32, i32
  }
  func.func @transform_6(%arg0: i32, %arg1: i32) -> (i32, i32) {
    %c0_i32 = arith.constant 0 : i32
    %c0_i32_0 = arith.constant 0 : i32
    %c0_i32_1 = arith.constant 0 : i32
    return %c0_i32, %c0_i32_0 : i32, i32
  }
  func.func @transform_7(%arg0: i32, %arg1: i32) -> (i32, i32) {
    %c0_i32 = arith.constant 0 : i32
    return %arg0, %arg1 : i32, i32
  }
}

</mosaic_0001>

<bundles_post_ra>
// kernel: albert_mlm_head.1
= control target key start
LH: loop header
LB: loop body
LE: loop exit
PB: predicated region body
PF: predicated region fallthrough
CT: control target
= control target key end

     0   :  { %v343_v1 = vmov 0.0   ;;  %vm344_vm0 = vmmov 0   ;;  %s434_s0 = inlined_call_operand.vmem [shape: bf16[16,32], index: 0, kind: input, shape index: {}]   ;;  %s435_s1 = inlined_call_operand.vmem [shape: bf16[32,32], index: 1, kind: input, shape index: {}]   ;;  %s436_s2 = inlined_call_operand.vmem [shape: f32[1,32], index: 2, kind: input, shape index: {}]   ;;  %s437_s3 = inlined_call_operand.vmem [shape: f32[1,32], index: 3, kind: input, shape index: {}]   ;;  %s438_s4 = inlined_call_operand.vmem [shape: f32[1,32], index: 4, kind: input, shape index: {}]   ;;  %s439_s5 = inlined_call_operand.vmem [shape: bf16[32,128], index: 5, kind: input, shape index: {}]   ;;  %s440_s6 = inlined_call_operand.vmem [shape: f32[1,128], index: 6, kind: input, shape index: {}]   ;;  %s441_s7 = inlined_call_operand.hbm [shape: f32[16,128], index: 7, kind: output, shape index: {}]  }
   0x1   :  { %v306_v0 = vld [vmem:[%s435_s1] sm:$0xff]   ;;  %285 = vmatprep.subr.bf16.mxu0 %v343_v1  ;;  %293 = vmatprep.subr.bf16.mxu1 %v343_v1  ;;  %v307_v2 = vld [vmem:[%s435_s1 + $0x8] sm:$0xff]  }
   0x2   :  { %286 = vmatpush3.bf16.msra.mxu0 %v306_v0  ;;  %289 = vmatprep.mubr.msk.bf16.mxu0 %vm344_vm0, %v343_v1 }
   0x3   :  { %287 = vmatprep.subr.bf16.mxu0 %v343_v1  ;;  %297 = vmatprep.mubr.msk.bf16.mxu1 %vm344_vm0, %v343_v1 }
   0x4   :  { %12 = vsyncpa [#allocation4], 0  ;;  %v308_v3 = vld [vmem:[%s434_s0] sm:$0xff]   ;;  %vm62_vm1 = vcmask 261120   ;;  %v310_v42 = vld [vmem:[%s439_s5 + $0x8] sm:$0xff]  }
   0x5   :  { %v268_v4 = vld [vmem:[%s436_s2] ss:$0 sm:$0xff] }
   0x6   :  { %288 = vmatpush3.bf16.msra.mxu0 %v307_v2  ;;  %v309_v41 = vld [vmem:[%s439_s5] sm:$0xff]  }
   0x7   :  { %294 = vmatpush3.bf16.msra.mxu1 %v309_v41  ;;  %v273_v51 = vld [vmem:[%s437_s3] ss:$0 sm:$0xff]  ;;  %s345_s3 = smov [#allocation3]  }
   0x8   :  { %295 = vmatprep.subr.bf16.mxu1 %v343_v1  ;;  %v274_v55 = vld [vmem:[%s438_s4] ss:$0 sm:$0xff]  ;;  %s254_s15 = sshll.u32 %s345_s3, 4  ;;  %s255_s15 = int_to_ptr.vmem [resolvable:$true] %s254_s15 }
   0x9   :  { %290 = vmatmul.mubr.msk.bf16.vlgmr.msra.gmra.mrb[0].mxu0 %vm62_vm1, %v308_v3  ;;  %v275_v61 = vld [vmem:[%s440_s6] ss:$0 sm:$0xff]  ;;  %s319_s4 = scalar_lea.vmem %s255_s15, 256  ;;  %p324_p1 = scmp.lt.s32.totalorder %s255_s15, %s255_s15 }
   0xa   :  { %p320_p0 = scmp.ne.s32.totalorder %s255_s15, %s319_s4  ;;  %p325_p2 = scmp.lt.s32.totalorder %s319_s4, %s319_s4 }
   0xb   :  { %296 = vmatpush3.bf16.msra.mxu1 %v310_v42 }
   0xc   :  { %p326_p3 = por %p325_p2, %p324_p1 }
   0xe   :  { %p327_p4 = pnand %p326_p3, %p320_p0 }
  0xdc   :  { %v100_v5 = vpop.f32.mrb[0].mxu0 }
  0xdd   :  { %v101_v6 = vadd.f32 %v268_v4, %v100_v5  ;;  %v291_v7 = vpop.f32.mrb[1].mxu0 }
  0xde   :  { %v103_v8 = vpop.f32.mrb[2].mxu0 }
  0xdf   :  { %v109_v9 = vmul.f32 0.044715, %v101_v6  ;;  %v104_v10 = vadd.f32 %v268_v4, %v103_v8  ;;  %v292_v11 = vpop.f32.mrb[3].mxu0  ;;  %v107_v22 = vmul.f32 0.5, %v101_v6 }
  0xe1   :  { %v110_v12 = vmul.f32 0.044715, %v104_v10  ;;  %v111_v13 = vmul.f32 %v109_v9, %v101_v6  ;;  %v108_v26 = vmul.f32 0.5, %v104_v10 }
  0xe3   :  { %v113_v14 = vmul.f32 %v111_v13, %v101_v6  ;;  %v112_v15 = vmul.f32 %v110_v12, %v104_v10 }
  0xe5   :  { %v115_v16 = vadd.f32 %v113_v14, %v101_v6  ;;  %v114_v17 = vmul.f32 %v112_v15, %v104_v10 }
  0xe7   :  { %v117_v18 = vmul.f32 0.7978846, %v115_v16  ;;  %v116_v19 = vadd.f32 %v114_v17, %v104_v10 }
  0xe9   :  { %311 = vtanh.f32 %v117_v18  ;;  %v118_v20 = vmul.f32 0.7978846, %v116_v19 }
  0xeb   :  { %313 = vtanh.f32 %v118_v20 }
  0xf3   :  { %v312_v21 = vpop.eup %311 }
  0xf4   :  { %v121_v23 = vadd.f32 1.0, %v312_v21 }
  0xf5   :  { %v314_v24 = vpop.eup %313 }
  0xf6   :  { %v123_v25 = vmul.f32 %v121_v23, %v107_v22  ;;  %v122_v27 = vadd.f32 1.0, %v314_v24 }
  0xf8   :  { %v125_v28 = vsel %vm62_vm1, %v123_v25, 0.0  ;;  %v124_v29 = vmul.f32 %v122_v27, %v108_v26 }
  0xf9   :  { %126 = vadd.xlane.f32.xlu0 %v125_v28 }
  0xfa   :  { %v128_v30 = vsel %vm62_vm1, %v124_v29, 0.0 }
  0xfd   :  { %129 = vadd.xlane.f32.xlu0 %v128_v30 }
 0x186   :  { %v127_v31 = vpop.xlane.xlu0 %126 }
 0x187   :  { %v132_v32 = vmul.f32 0.03125, %v127_v31 }
 0x189   :  { %v134_v33 = vsub.f32 %v123_v25, %v132_v32 }
 0x18a   :  { %v130_v34 = vpop.xlane.xlu0 %129 }
 0x18b   :  { %v133_v35 = vmul.f32 0.03125, %v130_v34  ;;  %v136_v36 = vmul.f32 %v134_v33, %v134_v33 }
 0x18d   :  { %v135_v37 = vsub.f32 %v124_v29, %v133_v35  ;;  %v138_v38 = vsel %vm62_vm1, %v136_v36, 0.0 }
 0x18e   :  { %139 = vadd.xlane.f32.xlu1 %v138_v38 }
 0x18f   :  { %v137_v39 = vmul.f32 %v135_v37, %v135_v37 }
 0x191   :  { %v141_v40 = vsel %vm62_vm1, %v137_v39, 0.0 }
 0x192   :  { %142 = vadd.xlane.f32.xlu1 %v141_v40 }
 0x21b   :  { %v140_v43 = vpop.xlane.xlu1 %139 }
 0x21c   :  { %v144_v44 = vmul.f32 0.03125, %v140_v43 }
 0x21e   :  { %v146_v45 = vadd.f32 1e-05, %v144_v44 }
 0x21f   :  { %v143_v46 = vpop.xlane.xlu1 %142 }
 0x220   :  { %315 = vrsqrt.f32 %v146_v45  ;;  %v145_v47 = vmul.f32 0.03125, %v143_v46 }
 0x222   :  { %v147_v48 = vadd.f32 1e-05, %v145_v47 }
 0x224   :  { %317 = vrsqrt.f32 %v147_v48 }
 0x22a   :  { %v316_v49 = vpop.eup %315 }
 0x22b   :  { %v150_v50 = vmul.f32 %v316_v49, %v134_v33 }
 0x22d   :  { %v159_v53 = vmul.f32 %v273_v51, %v150_v50 }
 0x22e   :  { %v318_v52 = vpop.eup %317 }
 0x22f   :  { %v151_v54 = vmul.f32 %v318_v52, %v135_v37  ;;  %v168_v57 = vadd.f32 %v274_v55, %v159_v53 }
 0x231   :  { %v160_v56 = vmul.f32 %v273_v51, %v151_v54 }
 0x233   :  { %v169_v58 = vadd.f32 %v274_v55, %v160_v56 }
 0x235   :  { %v170_v59 = vpack.c.bf16 %v169_v58, %v168_v57 }
 0x237   :  { %171 = vst.msk [vmem:[#allocation2] sm:$0xff] %vm62_vm1, %v170_v59 }
 0x23e   :  { %v183_v60 = vld [vmem:[#allocation2] sm:$0xff] }
 0x23f   :  { %298 = vmatmul.mubr.msk.bf16.vlgmr.msra.gmra.mrb[0].mxu1 %vm62_vm1, %v183_v60 }
 0x312   :  { %v240_v62 = vpop.f32.mrb[0].mxu1 }
 0x313   :  { %v241_v63 = vadd.f32 %v275_v61, %v240_v62  ;;  %v299_v0 = vpop.f32.mrb[1].mxu1 }
 0x314   :  { %v243_v1 = vpop.f32.mrb[2].mxu1 }
 0x315   :  { %247 = vst [vmem:[#allocation3] sm:$0xff] %v241_v63  ;;  %v244_v2 = vadd.f32 %v275_v61, %v243_v1  ;;  %v300_v3 = vpop.f32.mrb[3].mxu1 }
 0x317   :  { %248 = vst [vmem:[#allocation3 + $0x8] sm:$0xff] %v244_v2 }
 0x318   :  { %330 = shalt.err (!%p327_p4)
}
 0x319   :  { %s331_s17 = scalar_lea.hbm %s441_s7, 256 }
 0x31a   :  { %p332_p5 = scmp.ne.s32.totalorder %s441_s7, %s331_s17  ;;  %p335_p6 = scmp.lt.u32.totalorder %s331_s17, %s441_s7 }
 0x31c   :  { %p337_p7 = pnand %p335_p6, %p332_p5 }
 0x31e   :  { %340 = shalt.err (!%p337_p7)
}
 0x31f   :  { %s346_s22 = smov 128   ;;  %s347_s23 = smov 8  }
 0x320   :  { %260 = dma.vmem_to_hbm [thread:$0]  %s255_s15, 256, %s441_s7, [#allocation4], %s346_s22, %s346_s22, %s347_s23  }
 0x321   :  { %341 = dma.done.wait [#allocation4], 256  }
 0x322   :  { %342 = vsyncadd [#allocation4], 4294967040 }
 0x323   :  { %264 = vsyncpa [#allocation4], 1 }

</bundles_post_ra>
